<compile_context>
chip_gen: v7x
topology: tpu7x:2x2x1
jax: 0.10.0
libtpu: 0.0.40
codegen_flags: <defaults>
</compile_context>

<pallas_src>
import functools

import jax
import jax.numpy as jnp
from jax.experimental import pallas as pl
from jax.experimental.pallas import tpu as pltpu


def _round_up(n, m):
    return (n + m - 1) // m * m


def _mlp_block(x, w1_ref, b1_ref, w2_ref, b2_ref, w3_ref, b3_ref, w4_ref, b4_ref):
    """4-layer MLP on one batch tile; f32 MXU accumulation, bias+ReLU in f32."""
    h = jnp.maximum(
        jnp.dot(x, w1_ref[...], preferred_element_type=jnp.float32) + b1_ref[...], 0.0)
    h = jnp.maximum(
        jnp.dot(h, w2_ref[...], preferred_element_type=jnp.float32) + b2_ref[...], 0.0)
    h = jnp.maximum(
        jnp.dot(h, w3_ref[...], preferred_element_type=jnp.float32) + b3_ref[...], 0.0)
    return jnp.dot(h, w4_ref[...], preferred_element_type=jnp.float32) + b4_ref[...]


def _mlp_kernel(x_ref, w1_ref, b1_ref, w2_ref, b2_ref,
                w3_ref, b3_ref, w4_ref, b4_ref, o_ref):
    """norm_reduce=False: write the (lane-dense, padded) output tile."""
    out = _mlp_block(x_ref[...], w1_ref, b1_ref, w2_ref, b2_ref,
                     w3_ref, b3_ref, w4_ref, b4_ref)
    o_ref[...] = out.astype(o_ref.dtype)


def _mlp_norm_kernel(x_ref, w1_ref, b1_ref, w2_ref, b2_ref,
                     w3_ref, b3_ref, w4_ref, b4_ref,
                     o_ref, acc_ref, *, batch, tile_b):
    """norm_reduce=True: fused Frobenius norm (sqrt of sum of squares)."""
    step = pl.program_id(0)

    @pl.when(step == 0)
    def _init():
        acc_ref[...] = jnp.zeros_like(acc_ref)

    out = _mlp_block(x_ref[...], w1_ref, b1_ref, w2_ref, b2_ref,
                     w3_ref, b3_ref, w4_ref, b4_ref)

    if batch % tile_b:  # static: mask padded rows (bias chain makes them nonzero)
        row = step * tile_b + jax.lax.broadcasted_iota(jnp.int32, out.shape, 0)
        out = jnp.where(row < batch, out, 0.0)

    acc_ref[...] = acc_ref[...] + jnp.sum(out * out, axis=(0, 1), keepdims=True)

    @pl.when(step == pl.num_programs(0) - 1)
    def _finalize():
        o_ref[...] = jnp.sqrt(acc_ref[...])


@functools.partial(jax.jit, static_argnames=("norm_reduce", "tile_b"))
def mlp_forward(x, params, norm_reduce=False, tile_b=512):
    """x: [B, in_size] float32. params: [in, out] weights, (1, out) biases."""
    w1, b1 = params["w1"], params["b1"]
    w2, b2 = params["w2"], params["b2"]
    w3, b3 = params["w3"], params["b3"]
    w4, b4 = params["w4"], params["b4"]

    B, in_size = x.shape
    out_size = w4.shape[1]

    # Lane-dense output: pad last-layer columns to a multiple of 128 so stores
    # are unmasked full-lane `vst`; padded columns compute exactly 0.
    out_pad = _round_up(out_size, 128)
    if out_pad != out_size:
        w4 = jnp.pad(w4, ((0, 0), (0, out_pad - out_size)))
        b4 = jnp.pad(b4, ((0, 0), (0, out_pad - out_size)))

    # Batch tiling (sublane-aligned); weights stay resident across the grid.
    tile_b = max(8, _round_up(tile_b, 8))
    tile_b = min(tile_b, _round_up(B, 8))
    b_pad = _round_up(B, tile_b)
    if b_pad != B:
        x = jnp.pad(x, ((0, b_pad - B), (0, 0)))
    grid = (b_pad // tile_b,)

    operands = (x, w1, b1, w2, b2, w3, b3, w4, b4)
    in_specs = [pl.BlockSpec((tile_b, in_size), lambda i: (i, 0))] + [
        pl.BlockSpec(a.shape, lambda i: (0, 0)) for a in operands[1:]
    ]

    if norm_reduce:
        kernel = functools.partial(_mlp_norm_kernel, batch=B, tile_b=tile_b)
        norm = pl.pallas_call(
            kernel,
            out_shape=jax.ShapeDtypeStruct((1, 1), jnp.float32),
            grid=grid,
            in_specs=in_specs,
            out_specs=pl.BlockSpec((1, 1), lambda i: (0, 0)),
            scratch_shapes=[pltpu.VMEM((1, 1), jnp.float32)],
            compiler_params=pltpu.CompilerParams(
                dimension_semantics=("arbitrary",)),  # cross-step reduction
        )(*operands)
        return norm[0, 0]  # scalar, matching torch.norm(out)

    out = pl.pallas_call(
        _mlp_kernel,
        out_shape=jax.ShapeDtypeStruct((b_pad, out_pad), x.dtype),
        grid=grid,
        in_specs=in_specs,
        out_specs=pl.BlockSpec((tile_b, out_pad), lambda i: (i, 0)),
        compiler_params=pltpu.CompilerParams(
            dimension_semantics=("parallel",)),  # shard batch over TCs (v7x)
    )(*operands)
    return out[:B, :out_size]


def init_params(key, in_size=10, out_size=1, hidden_dim=32):
    """Uniform +/- 1/sqrt(fan_in), like nn.Linear default.
    Weights stored [in, out] (transposed vs PyTorch); biases (1, out)."""
    dims = [(in_size, hidden_dim), (hidden_dim, hidden_dim),
            (hidden_dim, hidden_dim), (hidden_dim, out_size)]
    params = {}
    for i, (fan_in, fan_out) in enumerate(dims, start=1):
        key, kw, kb = jax.random.split(key, 3)
        bound = 1.0 / (fan_in ** 0.5)
        params[f"w{i}"] = jax.random.uniform(
            kw, (fan_in, fan_out), jnp.float32, -bound, bound)
        params[f"b{i}"] = jax.random.uniform(
            kb, (1, fan_out), jnp.float32, -bound, bound)
    return params


def _reference(x, params, norm_reduce=False):
    h = x
    for i in range(1, 4):
        h = jnp.maximum(h @ params[f"w{i}"] + params[f"b{i}"], 0.0)
    out = h @ params["w4"] + params["b4"]
    if norm_reduce:
        return jnp.sqrt(jnp.sum(out * out))
    return out


if __name__ == "__main__":
    key = jax.random.PRNGKey(0)
    k_param, k_x1, k_x2 = jax.random.split(key, 3)

    in_size, out_size, hidden_dim = 10, 1, 32
    params = init_params(k_param, in_size, out_size, hidden_dim)

    # Case 1: batch=8 (no padding), both paths.
    x = jax.random.normal(k_x1, (8, in_size), jnp.float32)
    y = mlp_forward(x, params, norm_reduce=False)
    n = mlp_forward(x, params, norm_reduce=True)
    jax.block_until_ready((y, n))
    assert y.shape == (8, out_size)
    assert n.shape == ()
    assert jnp.allclose(y, _reference(x, params), atol=1e-4, rtol=1e-4), "mismatch (no reduce)"
    assert jnp.allclose(n, _reference(x, params, True), atol=1e-4, rtol=1e-4), "mismatch (norm)"

    # Case 2: batch=40 with a small tile -> padded batch, multi-step grid,
    # cross-step accumulation + row masking in the fused norm.
    x2 = jax.random.normal(k_x2, (40, in_size), jnp.float32)
    y2 = mlp_forward(x2, params, tile_b=16)
    n2 = mlp_forward(x2, params, norm_reduce=True, tile_b=16)
    jax.block_until_ready((y2, n2))
    assert jnp.allclose(y2, _reference(x2, params), atol=1e-4, rtol=1e-4), "mismatch (grid, no reduce)"
    assert jnp.allclose(n2, _reference(x2, params, True), atol=1e-4, rtol=1e-4), "mismatch (grid, norm)"

    print("KERNEL_OK")
</pallas_src>

<mosaic_0001>
module attributes {stable_mosaic.version = 11 : i64} {
  func.func @_mlp_kernel(%arg0: i32, %arg1: memref<8x10xf32, #tpu.memory_space<vmem>>, %arg2: memref<10x32xf32, #tpu.memory_space<vmem>>, %arg3: memref<1x32xf32, #tpu.memory_space<vmem>>, %arg4: memref<32x32xf32, #tpu.memory_space<vmem>>, %arg5: memref<1x32xf32, #tpu.memory_space<vmem>>, %arg6: memref<32x32xf32, #tpu.memory_space<vmem>>, %arg7: memref<1x32xf32, #tpu.memory_space<vmem>>, %arg8: memref<32x128xf32, #tpu.memory_space<vmem>>, %arg9: memref<1x128xf32, #tpu.memory_space<vmem>>, %arg10: memref<8x128xf32, #tpu.memory_space<vmem>>) attributes {dimension_semantics = [#tpu.dimension_semantics<parallel>], iteration_bounds = array<i64: 1>, scalar_prefetch = 0 : i64, scratch_operands = 0 : i64, tpu.core_type = #tpu.core_type<tc>, window_params = [{transform_indices = @transform_0, window_bounds = array<i64: 8, 10>}, {pipeline_mode = #tpu.pipeline_mode<synchronous>, transform_indices = @transform_1, window_bounds = array<i64: 10, 32>}, {pipeline_mode = #tpu.pipeline_mode<synchronous>, transform_indices = @transform_2, window_bounds = array<i64: 1, 32>}, {pipeline_mode = #tpu.pipeline_mode<synchronous>, transform_indices = @transform_3, window_bounds = array<i64: 32, 32>}, {pipeline_mode = #tpu.pipeline_mode<synchronous>, transform_indices = @transform_4, window_bounds = array<i64: 1, 32>}, {pipeline_mode = #tpu.pipeline_mode<synchronous>, transform_indices = @transform_5, window_bounds = array<i64: 32, 32>}, {pipeline_mode = #tpu.pipeline_mode<synchronous>, transform_indices = @transform_6, window_bounds = array<i64: 1, 32>}, {pipeline_mode = #tpu.pipeline_mode<synchronous>, transform_indices = @transform_7, window_bounds = array<i64: 32, 128>}, {pipeline_mode = #tpu.pipeline_mode<synchronous>, transform_indices = @transform_8, window_bounds = array<i64: 1, 128>}, {transform_indices = @transform_9, window_bounds = array<i64: 8, 128>}]} {
    %c0 = arith.constant 0 : index
    %c0_0 = arith.constant 0 : index
    %0 = vector.load %arg1[%c0, %c0_0] : memref<8x10xf32, #tpu.memory_space<vmem>>, vector<8x10xf32>
    %c0_1 = arith.constant 0 : index
    %c0_2 = arith.constant 0 : index
    %1 = vector.load %arg2[%c0_1, %c0_2] : memref<10x32xf32, #tpu.memory_space<vmem>>, vector<10x32xf32>
    %cst = arith.constant dense<0.000000e+00> : vector<8x32xf32>
    %2 = tpu.matmul %0, %1, %cst {dimension_numbers = #tpu.dot_dimension_numbers<[1], [0], [0], [1], [0, 0, 1, 1], [], []>} : vector<8x10xf32>, vector<10x32xf32>, vector<8x32xf32> -> vector<8x32xf32>
    %c0_3 = arith.constant 0 : index
    %c0_4 = arith.constant 0 : index
    %3 = vector.load %arg3[%c0_3, %c0_4] : memref<1x32xf32, #tpu.memory_space<vmem>>, vector<1x32xf32>
    %4 = vector.broadcast %3 : vector<1x32xf32> to vector<8x32xf32>
    %5 = arith.addf %2, %4 : vector<8x32xf32>
    %cst_5 = arith.constant 0.000000e+00 : f32
    %6 = vector.broadcast %cst_5 : f32 to vector<8x32xf32>
    %7 = arith.maximumf %5, %6 : vector<8x32xf32>
    %c0_6 = arith.constant 0 : index
    %c0_7 = arith.constant 0 : index
    %8 = vector.load %arg4[%c0_6, %c0_7] : memref<32x32xf32, #tpu.memory_space<vmem>>, vector<32x32xf32>
    %cst_8 = arith.constant dense<0.000000e+00> : vector<8x32xf32>
    %9 = tpu.matmul %7, %8, %cst_8 {dimension_numbers = #tpu.dot_dimension_numbers<[1], [0], [0], [1], [0, 0, 1, 1], [], []>} : vector<8x32xf32>, vector<32x32xf32>, vector<8x32xf32> -> vector<8x32xf32>
    %c0_9 = arith.constant 0 : index
    %c0_10 = arith.constant 0 : index
    %10 = vector.load %arg5[%c0_9, %c0_10] : memref<1x32xf32, #tpu.memory_space<vmem>>, vector<1x32xf32>
    %11 = vector.broadcast %10 : vector<1x32xf32> to vector<8x32xf32>
    %12 = arith.addf %9, %11 : vector<8x32xf32>
    %cst_11 = arith.constant 0.000000e+00 : f32
    %13 = vector.broadcast %cst_11 : f32 to vector<8x32xf32>
    %14 = arith.maximumf %12, %13 : vector<8x32xf32>
    %c0_12 = arith.constant 0 : index
    %c0_13 = arith.constant 0 : index
    %15 = vector.load %arg6[%c0_12, %c0_13] : memref<32x32xf32, #tpu.memory_space<vmem>>, vector<32x32xf32>
    %cst_14 = arith.constant dense<0.000000e+00> : vector<8x32xf32>
    %16 = tpu.matmul %14, %15, %cst_14 {dimension_numbers = #tpu.dot_dimension_numbers<[1], [0], [0], [1], [0, 0, 1, 1], [], []>} : vector<8x32xf32>, vector<32x32xf32>, vector<8x32xf32> -> vector<8x32xf32>
    %c0_15 = arith.constant 0 : index
    %c0_16 = arith.constant 0 : index
    %17 = vector.load %arg7[%c0_15, %c0_16] : memref<1x32xf32, #tpu.memory_space<vmem>>, vector<1x32xf32>
    %18 = vector.broadcast %17 : vector<1x32xf32> to vector<8x32xf32>
    %19 = arith.addf %16, %18 : vector<8x32xf32>
    %cst_17 = arith.constant 0.000000e+00 : f32
    %20 = vector.broadcast %cst_17 : f32 to vector<8x32xf32>
    %21 = arith.maximumf %19, %20 : vector<8x32xf32>
    %c0_18 = arith.constant 0 : index
    %c0_19 = arith.constant 0 : index
    %22 = vector.load %arg8[%c0_18, %c0_19] : memref<32x128xf32, #tpu.memory_space<vmem>>, vector<32x128xf32>
    %cst_20 = arith.constant dense<0.000000e+00> : vector<8x128xf32>
    %23 = tpu.matmul %21, %22, %cst_20 {dimension_numbers = #tpu.dot_dimension_numbers<[1], [0], [0], [1], [0, 0, 1, 1], [], []>} : vector<8x32xf32>, vector<32x128xf32>, vector<8x128xf32> -> vector<8x128xf32>
    %c0_21 = arith.constant 0 : index
    %c0_22 = arith.constant 0 : index
    %24 = vector.load %arg9[%c0_21, %c0_22] : memref<1x128xf32, #tpu.memory_space<vmem>>, vector<1x128xf32>
    %25 = vector.broadcast %24 : vector<1x128xf32> to vector<8x128xf32>
    %26 = arith.addf %23, %25 : vector<8x128xf32>
    %c0_23 = arith.constant 0 : index
    %c0_24 = arith.constant 0 : index
    %27 = vector.load %arg10[%c0_23, %c0_24] : memref<8x128xf32, #tpu.memory_space<vmem>>, vector<8x128xf32>
    tpu.vector_store %arg10[%c0_23, %c0_24], %26 {strides = array<i32>} : memref<8x128xf32, #tpu.memory_space<vmem>>, vector<8x128xf32>,
    return
  }
  func.func @transform_0(%arg0: i32) -> (i32, i32) {
    %c0_i32 = arith.constant 0 : i32
    %c0_i32_0 = arith.constant 0 : i32
    return %arg0, %c0_i32 : i32, i32
  }
  func.func @transform_1(%arg0: i32) -> (i32, i32) {
    %c0_i32 = arith.constant 0 : i32
    %c0_i32_0 = arith.constant 0 : i32
    %c0_i32_1 = arith.constant 0 : i32
    return %c0_i32, %c0_i32_0 : i32, i32
  }
  func.func @transform_2(%arg0: i32) -> (i32, i32) {
    %c0_i32 = arith.constant 0 : i32
    %c0_i32_0 = arith.constant 0 : i32
    %c0_i32_1 = arith.constant 0 : i32
    return %c0_i32, %c0_i32_0 : i32, i32
  }
  func.func @transform_3(%arg0: i32) -> (i32, i32) {
    %c0_i32 = arith.constant 0 : i32
    %c0_i32_0 = arith.constant 0 : i32
    %c0_i32_1 = arith.constant 0 : i32
    return %c0_i32, %c0_i32_0 : i32, i32
  }
  func.func @transform_4(%arg0: i32) -> (i32, i32) {
    %c0_i32 = arith.constant 0 : i32
    %c0_i32_0 = arith.constant 0 : i32
    %c0_i32_1 = arith.constant 0 : i32
    return %c0_i32, %c0_i32_0 : i32, i32
  }
  func.func @transform_5(%arg0: i32) -> (i32, i32) {
    %c0_i32 = arith.constant 0 : i32
    %c0_i32_0 = arith.constant 0 : i32
    %c0_i32_1 = arith.constant 0 : i32
    return %c0_i32, %c0_i32_0 : i32, i32
  }
  func.func @transform_6(%arg0: i32) -> (i32, i32) {
    %c0_i32 = arith.constant 0 : i32
    %c0_i32_0 = arith.constant 0 : i32
    %c0_i32_1 = arith.constant 0 : i32
    return %c0_i32, %c0_i32_0 : i32, i32
  }
  func.func @transform_7(%arg0: i32) -> (i32, i32) {
    %c0_i32 = arith.constant 0 : i32
    %c0_i32_0 = arith.constant 0 : i32
    %c0_i32_1 = arith.constant 0 : i32
    return %c0_i32, %c0_i32_0 : i32, i32
  }
  func.func @transform_8(%arg0: i32) -> (i32, i32) {
    %c0_i32 = arith.constant 0 : i32
    %c0_i32_0 = arith.constant 0 : i32
    %c0_i32_1 = arith.constant 0 : i32
    return %c0_i32, %c0_i32_0 : i32, i32
  }
  func.func @transform_9(%arg0: i32) -> (i32, i32) {
    %c0_i32 = arith.constant 0 : i32
    %c0_i32_0 = arith.constant 0 : i32
    return %arg0, %c0_i32 : i32, i32
  }
}

</mosaic_0001>

<bundles_post_ra>
// kernel: mlp_forward.1
= control target key start
LH: loop header
LB: loop body
LE: loop exit
PB: predicated region body
PF: predicated region fallthrough
CT: control target
= control target key end

     0   :  { %vm46_vm0 = vcmask 1041408   ;;  %v474_v0 = vmov 0.0|0.0   ;;  %vm475_vm1 = vmmov 1   ;;  %vm476_vm3 = vmmov 0   ;;  %s595_s1 = inlined_call_operand.vmem [shape: f32[10,32], index: 1, kind: input, shape index: {}]   ;;  %s596_s3 = inlined_call_operand.vmem [shape: f32[32,32], index: 3, kind: input, shape index: {}]   ;;  %s597_s0 = inlined_call_operand.vmem [shape: f32[8,10], index: 0, kind: input, shape index: {}]   ;;  %s598_s5 = inlined_call_operand.vmem [shape: f32[32,32], index: 5, kind: input, shape index: {}]   ;;  %s599_s2 = inlined_call_operand.vmem [shape: f32[1,32], index: 2, kind: input, shape index: {}]   ;;  %s600_s7 = inlined_call_operand.vmem [shape: f32[32,128], index: 7, kind: input, shape index: {}]   ;;  %s601_s4 = inlined_call_operand.vmem [shape: f32[1,32], index: 4, kind: input, shape index: {}]   ;;  %s602_s6 = inlined_call_operand.vmem [shape: f32[1,32], index: 6, kind: input, shape index: {}]   ;;  %s603_s8 = inlined_call_operand.vmem [shape: f32[1,128], index: 8, kind: input, shape index: {}]   ;;  %s604_s9 = inlined_call_operand.vmem [shape: f32[8,128], index: 9, kind: output, shape index: {}]  }
   0x1   :  { %448 = vmatprep.subr.bf16.mxu0 %v474_v0  ;;  %v33_v1 = vld [vmem:[%s595_s1] sm:$0xff]  ;;  %v34_v2 = vld [vmem:[%s595_s1 + $0x8] sm:$0x3]  ;;  %vm450_vm2 = vmpackc.low %vm46_vm0, %vm475_vm1  ;;  %452 = vmatprep.subr.bf16.mxu1 %v474_v0  ;;  %v477_v4 = vmov 0.0   ;;  %vm42_vm4 = vcmask 80896   ;;  %vm132_vm5 = vcmask 261120  }
   0x2   :  { %v449_v3 = vpack.c.bf16 %v34_v2, %v33_v1  ;;  %412 = vmatprep.mubr.msk.f32.mxu0 %vm476_vm3, %v477_v4  ;;  %v121_v5 = vld [vmem:[%s596_s3] sm:$0xff]  ;;  %v122_v6 = vld [vmem:[%s596_s3 + $0x8] sm:$0xff]  ;;  %423 = vmatprep.mubr.msk.f32.mxu1 %vm476_vm3, %v477_v4  ;;  %v123_v9 = vld [vmem:[%s596_s3 + $0x10] sm:$0xff] }
   0x3   :  { %v453_v7 = vpack.c.bf16 %v122_v6, %v121_v5  ;;  %v32_v8 = vld [vmem:[%s597_s0] sm:$0xff]  ;;  %v124_v10 = vld [vmem:[%s596_s3 + $0x18] sm:$0xff]  ;;  %v208_v13 = vld [vmem:[%s598_s5 + $0x8] sm:$0xff] }
   0x4   :  { %451 = vmatpush3.bf16.msk.msra.mxu0 %vm450_vm2, %v449_v3  ;;  %v456_v11 = vpack.c.bf16 %v124_v10, %v123_v9  ;;  %v207_v12 = vld [vmem:[%s598_s5] sm:$0xff]  ;;  %v209_v20 = vld [vmem:[%s598_s5 + $0x10] sm:$0xff]  ;;  %v210_v21 = vld [vmem:[%s598_s5 + $0x18] sm:$0xff] }
   0x5   :  { %454 = vmatpush3.bf16.msra.mxu1 %v453_v7  ;;  %458 = vmatprep.subr.bf16.mxu0 %v474_v0  ;;  %v459_v14 = vpack.c.bf16 %v208_v13, %v207_v12  ;;  %v381_v15 = vld [vmem:[%s599_s2] ss:$0 sm:$0xff]  ;;  %v462_v22 = vpack.c.bf16 %v210_v21, %v209_v20  ;;  %v293_v24 = vld [vmem:[%s600_s7 + $0x8] sm:$0xff]  ;;  %v294_v31 = vld [vmem:[%s600_s7 + $0x10] sm:$0xff] }
   0x6   :  { %455 = vmatprep.subr.bf16.mxu1 %v474_v0  ;;  %v292_v23 = vld [vmem:[%s600_s7] sm:$0xff]  ;;  %v295_v32 = vld [vmem:[%s600_s7 + $0x18] sm:$0xff] }
   0x7   :  { %413 = vmatmul.mubr.msk.f32.vlgmr.msra.gmra.mrb[0].mxu0 %vm42_vm4, %v32_v8  ;;  %v465_v25 = vpack.c.bf16 %v293_v24, %v292_v23  ;;  %v384_v26 = vld [vmem:[%s601_s4] ss:$0 sm:$0xff]  ;;  %v468_v33 = vpack.c.bf16 %v295_v32, %v294_v31 }
   0x8   :  { %434 = vmatprep.mubr.msk.f32.mxu0 %vm476_vm3, %v477_v4  ;;  %460 = vmatpush3.bf16.msra.mxu0 %v459_v14  ;;  %v386_v34 = vld [vmem:[%s602_s6] ss:$0 sm:$0xff] }
   0x9   :  { %457 = vmatpush3.bf16.msra.mxu1 %v456_v11  ;;  %461 = vmatprep.subr.bf16.mxu0 %v474_v0  ;;  %v388_v39 = vld [vmem:[%s603_s8] ss:$0 sm:$0xff] }
   0xa   :  { %464 = vmatprep.subr.bf16.mxu1 %v474_v0 }
   0xc   :  { %463 = vmatpush3.bf16.msra.mxu0 %v462_v22 }
  0xda   :  { %v116_v16 = vpop.f32.mrb[0].mxu0 }
  0xdb   :  { %v117_v17 = vadd.f32 %v381_v15, %v116_v16  ;;  %v414_v18 = vpop.f32.mrb[1].mxu0 }
  0xdd   :  { %v120_v19 = vmax.f32 %v117_v17, 0.0 }
  0xdf   :  { %424 = vmatmul.mubr.msk.f32.vlgmr.msra.gmra.mrb[0].mxu1 %vm132_vm5, %v120_v19 }
  0xe0   :  { %445 = vmatprep.mubr.msk.f32.mxu1 %vm476_vm3, %v477_v4  ;;  %466 = vmatpush3.bf16.msra.mxu1 %v465_v25 }
  0xe1   :  { %467 = vmatprep.subr.bf16.mxu1 %v474_v0 }
  0xe4   :  { %469 = vmatpush3.bf16.msra.mxu1 %v468_v33 }
 0x1b2   :  { %v202_v27 = vpop.f32.mrb[0].mxu1 }
 0x1b3   :  { %v203_v28 = vadd.f32 %v384_v26, %v202_v27  ;;  %v425_v29 = vpop.f32.mrb[1].mxu1 }
 0x1b5   :  { %v206_v30 = vmax.f32 %v203_v28, 0.0 }
 0x1b7   :  { %435 = vmatmul.mubr.msk.f32.vlgmr.msra.gmra.mrb[2].mxu0 %vm132_vm5, %v206_v30 }
 0x28a   :  { %v287_v35 = vpop.f32.mrb[2].mxu0 }
 0x28b   :  { %v288_v36 = vadd.f32 %v386_v34, %v287_v35  ;;  %v436_v37 = vpop.f32.mrb[3].mxu0 }
 0x28d   :  { %v291_v38 = vmax.f32 %v288_v36, 0.0 }
 0x28f   :  { %446 = vmatmul.mubr.msk.f32.vlgmr.msra.gmra.mrb[2].mxu1 %vm132_vm5, %v291_v38 }
 0x362   :  { %v372_v40 = vpop.f32.mrb[2].mxu1 }
 0x363   :  { %v373_v41 = vadd.f32 %v388_v39, %v372_v40  ;;  %v447_v42 = vpop.f32.mrb[3].mxu1 }
 0x365   :  { %376 = vst [vmem:[%s604_s9] sm:$0xff] %v373_v41 }

</bundles_post_ra>
